<compile_context>
chip_gen: v5e
topology: v5e:2x2
jax: 0.10.0
libtpu: 0.0.40
codegen_flags: <defaults>
</compile_context>

<pallas_src>
import functools

import jax
import jax.numpy as jnp
from jax.experimental import pallas as pl
from jax.experimental.pallas import tpu as pltpu

BN_EPS = 1e-5
_VMEM_LIMIT = 32 * 1024 * 1024  # safe on v5e/v6e/v7x


def _conv1x1(w, x):
    """w: (Cout, Cin), x: (Cin, Lt) -> (Cout, Lt), f32 accumulation."""
    c_out, c_in = w.shape
    if c_in <= 8:
        # Tiny contraction: Cin fused multiply-adds on the VPU; keeps L dense
        # on lanes and skips MXU lane padding entirely (kernel is mem-bound).
        y = w[:, 0:1] * x[0:1, :]
        for c in range(1, c_in):
            y = y + w[:, c:c + 1] * x[c:c + 1, :]
        return y
    return jnp.dot(w, x, preferred_element_type=jnp.float32)


def _stats_kernel(x_ref, w_ref, sum_ref, ssq_ref, sum_acc, ssq_acc):
    # grid = (N, L_tiles); x_ref: (1, Cin, Lt); w_ref: (Cout, Cin)
    # sum_ref / ssq_ref: (1, Cout, 1) per-batch partial accumulators
    lt = pl.program_id(1)

    @pl.when(lt == 0)
    def _init():
        sum_acc[...] = jnp.zeros_like(sum_acc)
        ssq_acc[...] = jnp.zeros_like(ssq_acc)

    x = x_ref[0].astype(jnp.float32)            # (Cin, Lt)
    w = w_ref[...].astype(jnp.float32)          # (Cout, Cin)
    y = _conv1x1(w, x)                          # (Cout, Lt) f32

    sum_acc[...] += jnp.sum(y, axis=-1, keepdims=True)        # (Cout, 1)
    ssq_acc[...] += jnp.sum(y * y, axis=-1, keepdims=True)    # (Cout, 1)

    # Write current accumulator into the (resident) output block each step.
    sum_ref[0] = sum_acc[...]
    ssq_ref[0] = ssq_acc[...]


def _norm_kernel(x_ref, w_ref, scale_ref, shift_ref, o_ref):
    # x_ref: (1, Cin, Lt); w_ref: (Cout, Cin); scale/shift: (Cout, 1)
    # o_ref: (1, Cout, Lt)  -- L on lanes -> lane-dense stores.
    x = x_ref[0].astype(jnp.float32)
    w = w_ref[...].astype(jnp.float32)
    y = _conv1x1(w, x)                                         # (Cout, Lt)
    out = y * scale_ref[...] + shift_ref[...]                  # BN (folded)
    o_ref[0] = jnp.maximum(out, 0.0).astype(o_ref.dtype)       # ReLU


def _pick_l_tile(length):
    # Largest lane-aligned tile that divides L (amortizes per-step overhead
    # while staying tiny in VMEM); fall back to the full extent for small L.
    for t in (1024, 512, 256, 128):
        if length % t == 0:
            return t
    return length


@functools.partial(jax.jit, static_argnames=())
def bottleneck_forward(x_ncl, weight, gamma, beta):
    """x_ncl: (N, Cin, L) f32; weight: (Cout, Cin, 1); gamma/beta: (Cout,)."""
    n, c_in, length = x_ncl.shape
    c_out = weight.shape[0]

    w_mat = weight[:, :, 0].astype(jnp.float32)  # (Cout, Cin)

    lt = _pick_l_tile(length)
    n_lt = length // lt

    # ---- Pass 1: per-batch partial sum / sum-of-squares per channel. ----
    psum, pssq = pl.pallas_call(
        _stats_kernel,
        out_shape=(
            jax.ShapeDtypeStruct((n, c_out, 1), jnp.float32),
            jax.ShapeDtypeStruct((n, c_out, 1), jnp.float32),
        ),
        grid_spec=pltpu.PrefetchScalarGridSpec(
            num_scalar_prefetch=0,
            grid=(n, n_lt),
            in_specs=[
                pl.BlockSpec((1, c_in, lt), lambda i, j: (i, 0, j)),
                pl.BlockSpec((c_out, c_in), lambda i, j: (0, 0)),
            ],
            out_specs=[
                pl.BlockSpec((1, c_out, 1), lambda i, j: (i, 0, 0)),
                pl.BlockSpec((1, c_out, 1), lambda i, j: (i, 0, 0)),
            ],
            scratch_shapes=[
                pltpu.VMEM((c_out, 1), jnp.float32),
                pltpu.VMEM((c_out, 1), jnp.float32),
            ],
        ),
        compiler_params=pltpu.CompilerParams(
            dimension_semantics=("parallel", "arbitrary"),
            vmem_limit_bytes=_VMEM_LIMIT,
        ),
    )(x_ncl, w_mat)

    # ---- Tiny finalize: global batch stats over all N*L positions. ----
    r = float(n * length)
    total = jnp.sum(psum[:, :, 0], axis=0)        # (Cout,)
    total_sq = jnp.sum(pssq[:, :, 0], axis=0)     # (Cout,)
    mean = total / r
    var = jnp.maximum(total_sq / r - mean * mean, 0.0)   # biased var
    inv_std = jax.lax.rsqrt(var + BN_EPS)
    scale = (gamma.astype(jnp.float32) * inv_std).reshape(c_out, 1)
    shift = (beta.astype(jnp.float32) - mean * gamma.astype(jnp.float32)
             * inv_std).reshape(c_out, 1)

    # ---- Pass 2: recompute y, normalize + affine + ReLU, write NCL. ----
    out = pl.pallas_call(
        _norm_kernel,
        out_shape=jax.ShapeDtypeStruct((n, c_out, length), jnp.float32),
        grid_spec=pltpu.PrefetchScalarGridSpec(
            num_scalar_prefetch=0,
            grid=(n, n_lt),
            in_specs=[
                pl.BlockSpec((1, c_in, lt), lambda i, j: (i, 0, j)),
                pl.BlockSpec((c_out, c_in), lambda i, j: (0, 0)),
                pl.BlockSpec((c_out, 1), lambda i, j: (0, 0)),
                pl.BlockSpec((c_out, 1), lambda i, j: (0, 0)),
            ],
            out_specs=pl.BlockSpec((1, c_out, lt), lambda i, j: (i, 0, j)),
        ),
        compiler_params=pltpu.CompilerParams(
            dimension_semantics=("parallel", "parallel"),
            vmem_limit_bytes=_VMEM_LIMIT,
        ),
    )(x_ncl, w_mat, scale, shift)
    return out


def _reference_forward(x_ncl, weight, gamma, beta):
    """Pure-JAX reference (conv1d k=1 -> train-mode BN -> ReLU)."""
    w = weight[:, :, 0]  # (Cout, Cin)
    y = jnp.einsum("pc,ncl->npl", w, x_ncl)
    mean = jnp.mean(y, axis=(0, 2), keepdims=True)
    var = jnp.mean((y - mean) ** 2, axis=(0, 2), keepdims=True)
    y_hat = (y - mean) * jax.lax.rsqrt(var + BN_EPS)
    out = y_hat * gamma.reshape(1, -1, 1) + beta.reshape(1, -1, 1)
    return jnp.maximum(out, 0.0)


def _check(n, c_in, c_out, length, key, default_affine=True):
    kx, kw, kg, kb = jax.random.split(key, 4)
    x = jax.random.normal(kx, (n, c_in, length), dtype=jnp.float32)
    weight = jax.random.normal(kw, (c_out, c_in, 1), dtype=jnp.float32) * 0.5
    if default_affine:
        gamma = jnp.ones((c_out,), dtype=jnp.float32)
        beta = jnp.zeros((c_out,), dtype=jnp.float32)
    else:
        gamma = jax.random.normal(kg, (c_out,), dtype=jnp.float32) * 0.3 + 1.0
        beta = jax.random.normal(kb, (c_out,), dtype=jnp.float32) * 0.1

    out = bottleneck_forward(x, weight, gamma, beta)
    jax.block_until_ready(out)
    ref = _reference_forward(x, weight, gamma, beta)
    assert out.shape == (n, c_out, length)
    assert jnp.allclose(out, ref, atol=1e-4, rtol=1e-4), (
        float(jnp.max(jnp.abs(out - ref))))


if __name__ == "__main__":
    key = jax.random.PRNGKey(0)
    k1, k2 = jax.random.split(key)

    # Small shapes consistent with the module: Bottleneck(inplanes=4, planes=8)
    _check(n=2, c_in=4, c_out=8, length=16, key=k1, default_affine=True)
    # Exercise the multi-L-tile path (L = 3 * 128) and the affine params.
    _check(n=2, c_in=4, c_out=8, length=384, key=k2, default_affine=False)

    print("KERNEL_OK")
</pallas_src>

<mosaic_0001>
module attributes {stable_mosaic.version = 11 : i64} {
  func.func @_stats_kernel(%arg0: i32, %arg1: i32, %arg2: memref<1x4x16xf32, #tpu.memory_space<vmem>>, %arg3: memref<8x4xf32, #tpu.memory_space<vmem>>, %arg4: memref<1x8x1xf32, #tpu.memory_space<vmem>>, %arg5: memref<1x8x1xf32, #tpu.memory_space<vmem>>, %arg6: memref<8x1xf32, #tpu.memory_space<vmem>>, %arg7: memref<8x1xf32, #tpu.memory_space<vmem>>) attributes {dimension_semantics = [#tpu.dimension_semantics<parallel>, #tpu.dimension_semantics<arbitrary>], iteration_bounds = array<i64: 2, 1>, scalar_prefetch = 0 : i64, scratch_operands = 2 : i64, tpu.core_type = #tpu.core_type<tc>, window_params = [{transform_indices = @transform_0, window_bounds = array<i64: 1, 4, 16>}, {pipeline_mode = #tpu.pipeline_mode<synchronous>, transform_indices = @transform_1, window_bounds = array<i64: 8, 4>}, {transform_indices = @transform_2, window_bounds = array<i64: 1, 8, 1>}, {transform_indices = @transform_3, window_bounds = array<i64: 1, 8, 1>}]} {
    %c0_i32 = arith.constant 0 : i32
    %0 = arith.cmpi eq, %arg1, %c0_i32 : i32
    %1 = arith.extui %0 : i1 to i32
    %c0_i32_0 = arith.constant 0 : i32
    %2 = arith.cmpi ne, %1, %c0_i32_0 : i32
    scf.if %2 {
      %cst_24 = arith.constant 0.000000e+00 : f32
      %48 = vector.broadcast %cst_24 : f32 to vector<8x1xf32>
      %c0_25 = arith.constant 0 : index
      %c0_26 = arith.constant 0 : index
      %49 = vector.load %arg6[%c0_25, %c0_26] : memref<8x1xf32, #tpu.memory_space<vmem>>, vector<8x1xf32>
      tpu.vector_store %arg6[%c0_25, %c0_26], %48 {strides = array<i32>} : memref<8x1xf32, #tpu.memory_space<vmem>>, vector<8x1xf32>,
      %cst_27 = arith.constant 0.000000e+00 : f32
      %50 = vector.broadcast %cst_27 : f32 to vector<8x1xf32>
      %c0_28 = arith.constant 0 : index
      %c0_29 = arith.constant 0 : index
      %51 = vector.load %arg7[%c0_28, %c0_29] : memref<8x1xf32, #tpu.memory_space<vmem>>, vector<8x1xf32>
      tpu.vector_store %arg7[%c0_28, %c0_29], %50 {strides = array<i32>} : memref<8x1xf32, #tpu.memory_space<vmem>>, vector<8x1xf32>,
    } else {
    }
    %c0 = arith.constant 0 : index
    %c0_1 = arith.constant 0 : index
    %c0_2 = arith.constant 0 : index
    %3 = vector.load %arg2[%c0, %c0_1, %c0_2] : memref<1x4x16xf32, #tpu.memory_space<vmem>>, vector<1x4x16xf32>
    %4 = vector.shape_cast %3 : vector<1x4x16xf32> to vector<4x16xf32>
    %c0_3 = arith.constant 0 : index
    %c0_4 = arith.constant 0 : index
    %5 = vector.load %arg3[%c0_3, %c0_4] : memref<8x4xf32, #tpu.memory_space<vmem>>, vector<8x4xf32>
    %6 = vector.extract_strided_slice %5 {offsets = [0, 0], sizes = [8, 1], strides = [1, 1]} : vector<8x4xf32> to vector<8x1xf32>
    %7 = vector.extract_strided_slice %4 {offsets = [0, 0], sizes = [1, 16], strides = [1, 1]} : vector<4x16xf32> to vector<1x16xf32>
    %8 = vector.broadcast %6 : vector<8x1xf32> to vector<8x16xf32>
    %9 = vector.broadcast %7 : vector<1x16xf32> to vector<8x16xf32>
    %10 = arith.mulf %8, %9 : vector<8x16xf32>
    %11 = vector.extract_strided_slice %5 {offsets = [0, 1], sizes = [8, 1], strides = [1, 1]} : vector<8x4xf32> to vector<8x1xf32>
    %12 = vector.extract_strided_slice %4 {offsets = [1, 0], sizes = [1, 16], strides = [1, 1]} : vector<4x16xf32> to vector<1x16xf32>
    %13 = vector.broadcast %11 : vector<8x1xf32> to vector<8x16xf32>
    %14 = vector.broadcast %12 : vector<1x16xf32> to vector<8x16xf32>
    %15 = arith.mulf %13, %14 : vector<8x16xf32>
    %16 = arith.addf %10, %15 : vector<8x16xf32>
    %17 = vector.extract_strided_slice %5 {offsets = [0, 2], sizes = [8, 1], strides = [1, 1]} : vector<8x4xf32> to vector<8x1xf32>
    %18 = vector.extract_strided_slice %4 {offsets = [2, 0], sizes = [1, 16], strides = [1, 1]} : vector<4x16xf32> to vector<1x16xf32>
    %19 = vector.broadcast %17 : vector<8x1xf32> to vector<8x16xf32>
    %20 = vector.broadcast %18 : vector<1x16xf32> to vector<8x16xf32>
    %21 = arith.mulf %19, %20 : vector<8x16xf32>
    %22 = arith.addf %16, %21 : vector<8x16xf32>
    %23 = vector.extract_strided_slice %5 {offsets = [0, 3], sizes = [8, 1], strides = [1, 1]} : vector<8x4xf32> to vector<8x1xf32>
    %24 = vector.extract_strided_slice %4 {offsets = [3, 0], sizes = [1, 16], strides = [1, 1]} : vector<4x16xf32> to vector<1x16xf32>
    %25 = vector.broadcast %23 : vector<8x1xf32> to vector<8x16xf32>
    %26 = vector.broadcast %24 : vector<1x16xf32> to vector<8x16xf32>
    %27 = arith.mulf %25, %26 : vector<8x16xf32>
    %28 = arith.addf %22, %27 : vector<8x16xf32>
    %c0_5 = arith.constant 0 : index
    %c0_6 = arith.constant 0 : index
    %29 = vector.load %arg6[%c0_5, %c0_6] : memref<8x1xf32, #tpu.memory_space<vmem>>, vector<8x1xf32>
    %cst = arith.constant dense<0.000000e+00> : vector<8xf32>
    %30 = vector.multi_reduction <add>, %28, %cst [1] : vector<8x16xf32> to vector<8xf32>
    %31 = vector.shape_cast %30 : vector<8xf32> to vector<8x1xf32>
    %32 = arith.addf %29, %31 : vector<8x1xf32>
    %c0_7 = arith.constant 0 : index
    %c0_8 = arith.constant 0 : index
    %33 = vector.load %arg6[%c0_7, %c0_8] : memref<8x1xf32, #tpu.memory_space<vmem>>, vector<8x1xf32>
    tpu.vector_store %arg6[%c0_7, %c0_8], %32 {strides = array<i32>} : memref<8x1xf32, #tpu.memory_space<vmem>>, vector<8x1xf32>,
    %c0_9 = arith.constant 0 : index
    %c0_10 = arith.constant 0 : index
    %34 = vector.load %arg7[%c0_9, %c0_10] : memref<8x1xf32, #tpu.memory_space<vmem>>, vector<8x1xf32>
    %35 = arith.mulf %28, %28 : vector<8x16xf32>
    %cst_11 = arith.constant dense<0.000000e+00> : vector<8xf32>
    %36 = vector.multi_reduction <add>, %35, %cst_11 [1] : vector<8x16xf32> to vector<8xf32>
    %37 = vector.shape_cast %36 : vector<8xf32> to vector<8x1xf32>
    %38 = arith.addf %34, %37 : vector<8x1xf32>
    %c0_12 = arith.constant 0 : index
    %c0_13 = arith.constant 0 : index
    %39 = vector.load %arg7[%c0_12, %c0_13] : memref<8x1xf32, #tpu.memory_space<vmem>>, vector<8x1xf32>
    tpu.vector_store %arg7[%c0_12, %c0_13], %38 {strides = array<i32>} : memref<8x1xf32, #tpu.memory_space<vmem>>, vector<8x1xf32>,
    %c0_14 = arith.constant 0 : index
    %c0_15 = arith.constant 0 : index
    %40 = vector.load %arg6[%c0_14, %c0_15] : memref<8x1xf32, #tpu.memory_space<vmem>>, vector<8x1xf32>
    %c0_16 = arith.constant 0 : index
    %c0_17 = arith.constant 0 : index
    %c0_18 = arith.constant 0 : index
    %41 = vector.load %arg4[%c0_16, %c0_17, %c0_18] : memref<1x8x1xf32, #tpu.memory_space<vmem>>, vector<1x8x1xf32>
    %42 = vector.shape_cast %41 : vector<1x8x1xf32> to vector<8x1xf32>
    %43 = vector.shape_cast %40 : vector<8x1xf32> to vector<1x8x1xf32>
    tpu.vector_store %arg4[%c0_16, %c0_17, %c0_18], %43 {strides = array<i32>} : memref<1x8x1xf32, #tpu.memory_space<vmem>>, vector<1x8x1xf32>,
    %c0_19 = arith.constant 0 : index
    %c0_20 = arith.constant 0 : index
    %44 = vector.load %arg7[%c0_19, %c0_20] : memref<8x1xf32, #tpu.memory_space<vmem>>, vector<8x1xf32>
    %c0_21 = arith.constant 0 : index
    %c0_22 = arith.constant 0 : index
    %c0_23 = arith.constant 0 : index
    %45 = vector.load %arg5[%c0_21, %c0_22, %c0_23] : memref<1x8x1xf32, #tpu.memory_space<vmem>>, vector<1x8x1xf32>
    %46 = vector.shape_cast %45 : vector<1x8x1xf32> to vector<8x1xf32>
    %47 = vector.shape_cast %44 : vector<8x1xf32> to vector<1x8x1xf32>
    tpu.vector_store %arg5[%c0_21, %c0_22, %c0_23], %47 {strides = array<i32>} : memref<1x8x1xf32, #tpu.memory_space<vmem>>, vector<1x8x1xf32>,
    return
  }
  func.func @transform_0(%arg0: i32, %arg1: i32) -> (i32, i32, i32) {
    %c0_i32 = arith.constant 0 : i32
    %c0_i32_0 = arith.constant 0 : i32
    return %arg0, %c0_i32, %arg1 : i32, i32, i32
  }
  func.func @transform_1(%arg0: i32, %arg1: i32) -> (i32, i32) {
    %c0_i32 = arith.constant 0 : i32
    %c0_i32_0 = arith.constant 0 : i32
    %c0_i32_1 = arith.constant 0 : i32
    return %c0_i32, %c0_i32_0 : i32, i32
  }
  func.func @transform_2(%arg0: i32, %arg1: i32) -> (i32, i32, i32) {
    %c0_i32 = arith.constant 0 : i32
    %c0_i32_0 = arith.constant 0 : i32
    %c0_i32_1 = arith.constant 0 : i32
    return %arg0, %c0_i32, %c0_i32_0 : i32, i32, i32
  }
  func.func @transform_3(%arg0: i32, %arg1: i32) -> (i32, i32, i32) {
    %c0_i32 = arith.constant 0 : i32
    %c0_i32_0 = arith.constant 0 : i32
    %c0_i32_1 = arith.constant 0 : i32
    return %arg0, %c0_i32, %c0_i32_0 : i32, i32, i32
  }
}

module attributes {stable_mosaic.version = 11 : i64} {
  func.func @_norm_kernel(%arg0: i32, %arg1: i32, %arg2: memref<1x4x16xf32, #tpu.memory_space<vmem>>, %arg3: memref<8x4xf32, #tpu.memory_space<vmem>>, %arg4: memref<8x1xf32, #tpu.memory_space<vmem>>, %arg5: memref<8x1xf32, #tpu.memory_space<vmem>>, %arg6: memref<1x8x16xf32, #tpu.memory_space<vmem>>) attributes {dimension_semantics = [#tpu.dimension_semantics<parallel>, #tpu.dimension_semantics<parallel>], iteration_bounds = array<i64: 2, 1>, scalar_prefetch = 0 : i64, scratch_operands = 0 : i64, tpu.core_type = #tpu.core_type<tc>, window_params = [{transform_indices = @transform_0, window_bounds = array<i64: 1, 4, 16>}, {pipeline_mode = #tpu.pipeline_mode<synchronous>, transform_indices = @transform_1, window_bounds = array<i64: 8, 4>}, {pipeline_mode = #tpu.pipeline_mode<synchronous>, transform_indices = @transform_2, window_bounds = array<i64: 8, 1>}, {pipeline_mode = #tpu.pipeline_mode<synchronous>, transform_indices = @transform_3, window_bounds = array<i64: 8, 1>}, {transform_indices = @transform_4, window_bounds = array<i64: 1, 8, 16>}]} {
    %c0 = arith.constant 0 : index
    %c0_0 = arith.constant 0 : index
    %c0_1 = arith.constant 0 : index
    %0 = vector.load %arg2[%c0, %c0_0, %c0_1] : memref<1x4x16xf32, #tpu.memory_space<vmem>>, vector<1x4x16xf32>
    %1 = vector.shape_cast %0 : vector<1x4x16xf32> to vector<4x16xf32>
    %c0_2 = arith.constant 0 : index
    %c0_3 = arith.constant 0 : index
    %2 = vector.load %arg3[%c0_2, %c0_3] : memref<8x4xf32, #tpu.memory_space<vmem>>, vector<8x4xf32>
    %3 = vector.extract_strided_slice %2 {offsets = [0, 0], sizes = [8, 1], strides = [1, 1]} : vector<8x4xf32> to vector<8x1xf32>
    %4 = vector.extract_strided_slice %1 {offsets = [0, 0], sizes = [1, 16], strides = [1, 1]} : vector<4x16xf32> to vector<1x16xf32>
    %5 = vector.broadcast %3 : vector<8x1xf32> to vector<8x16xf32>
    %6 = vector.broadcast %4 : vector<1x16xf32> to vector<8x16xf32>
    %7 = arith.mulf %5, %6 : vector<8x16xf32>
    %8 = vector.extract_strided_slice %2 {offsets = [0, 1], sizes = [8, 1], strides = [1, 1]} : vector<8x4xf32> to vector<8x1xf32>
    %9 = vector.extract_strided_slice %1 {offsets = [1, 0], sizes = [1, 16], strides = [1, 1]} : vector<4x16xf32> to vector<1x16xf32>
    %10 = vector.broadcast %8 : vector<8x1xf32> to vector<8x16xf32>
    %11 = vector.broadcast %9 : vector<1x16xf32> to vector<8x16xf32>
    %12 = arith.mulf %10, %11 : vector<8x16xf32>
    %13 = arith.addf %7, %12 : vector<8x16xf32>
    %14 = vector.extract_strided_slice %2 {offsets = [0, 2], sizes = [8, 1], strides = [1, 1]} : vector<8x4xf32> to vector<8x1xf32>
    %15 = vector.extract_strided_slice %1 {offsets = [2, 0], sizes = [1, 16], strides = [1, 1]} : vector<4x16xf32> to vector<1x16xf32>
    %16 = vector.broadcast %14 : vector<8x1xf32> to vector<8x16xf32>
    %17 = vector.broadcast %15 : vector<1x16xf32> to vector<8x16xf32>
    %18 = arith.mulf %16, %17 : vector<8x16xf32>
    %19 = arith.addf %13, %18 : vector<8x16xf32>
    %20 = vector.extract_strided_slice %2 {offsets = [0, 3], sizes = [8, 1], strides = [1, 1]} : vector<8x4xf32> to vector<8x1xf32>
    %21 = vector.extract_strided_slice %1 {offsets = [3, 0], sizes = [1, 16], strides = [1, 1]} : vector<4x16xf32> to vector<1x16xf32>
    %22 = vector.broadcast %20 : vector<8x1xf32> to vector<8x16xf32>
    %23 = vector.broadcast %21 : vector<1x16xf32> to vector<8x16xf32>
    %24 = arith.mulf %22, %23 : vector<8x16xf32>
    %25 = arith.addf %19, %24 : vector<8x16xf32>
    %c0_4 = arith.constant 0 : index
    %c0_5 = arith.constant 0 : index
    %26 = vector.load %arg4[%c0_4, %c0_5] : memref<8x1xf32, #tpu.memory_space<vmem>>, vector<8x1xf32>
    %27 = vector.broadcast %26 : vector<8x1xf32> to vector<8x16xf32>
    %28 = arith.mulf %25, %27 : vector<8x16xf32>
    %c0_6 = arith.constant 0 : index
    %c0_7 = arith.constant 0 : index
    %29 = vector.load %arg5[%c0_6, %c0_7] : memref<8x1xf32, #tpu.memory_space<vmem>>, vector<8x1xf32>
    %30 = vector.broadcast %29 : vector<8x1xf32> to vector<8x16xf32>
    %31 = arith.addf %28, %30 : vector<8x16xf32>
    %cst = arith.constant 0.000000e+00 : f32
    %32 = vector.broadcast %cst : f32 to vector<8x16xf32>
    %33 = arith.maximumf %31, %32 : vector<8x16xf32>
    %c0_8 = arith.constant 0 : index
    %c0_9 = arith.constant 0 : index
    %c0_10 = arith.constant 0 : index
    %34 = vector.load %arg6[%c0_8, %c0_9, %c0_10] : memref<1x8x16xf32, #tpu.memory_space<vmem>>, vector<1x8x16xf32>
    %35 = vector.shape_cast %34 : vector<1x8x16xf32> to vector<8x16xf32>
    %36 = vector.shape_cast %33 : vector<8x16xf32> to vector<1x8x16xf32>
    tpu.vector_store %arg6[%c0_8, %c0_9, %c0_10], %36 {strides = array<i32>} : memref<1x8x16xf32, #tpu.memory_space<vmem>>, vector<1x8x16xf32>,
    return
  }
  func.func @transform_0(%arg0: i32, %arg1: i32) -> (i32, i32, i32) {
    %c0_i32 = arith.constant 0 : i32
    %c0_i32_0 = arith.constant 0 : i32
    return %arg0, %c0_i32, %arg1 : i32, i32, i32
  }
  func.func @transform_1(%arg0: i32, %arg1: i32) -> (i32, i32) {
    %c0_i32 = arith.constant 0 : i32
    %c0_i32_0 = arith.constant 0 : i32
    %c0_i32_1 = arith.constant 0 : i32
    return %c0_i32, %c0_i32_0 : i32, i32
  }
  func.func @transform_2(%arg0: i32, %arg1: i32) -> (i32, i32) {
    %c0_i32 = arith.constant 0 : i32
    %c0_i32_0 = arith.constant 0 : i32
    %c0_i32_1 = arith.constant 0 : i32
    return %c0_i32, %c0_i32_0 : i32, i32
  }
  func.func @transform_3(%arg0: i32, %arg1: i32) -> (i32, i32) {
    %c0_i32 = arith.constant 0 : i32
    %c0_i32_0 = arith.constant 0 : i32
    %c0_i32_1 = arith.constant 0 : i32
    return %c0_i32, %c0_i32_0 : i32, i32
  }
  func.func @transform_4(%arg0: i32, %arg1: i32) -> (i32, i32, i32) {
    %c0_i32 = arith.constant 0 : i32
    %c0_i32_0 = arith.constant 0 : i32
    return %arg0, %c0_i32, %arg1 : i32, i32, i32
  }
}

</mosaic_0001>

<bundles_post_ra>
// kernel: bottleneck_forward.2
= control target key start
LH: loop header
LB: loop body
LE: loop exit
PB: predicated region body
PF: predicated region fallthrough
CT: control target
= control target key end

     0   :  { %s444_s12 = smov 0   ;;  %s446_s13 = smov 0   ;;  %s493_s0 = inlined_call_operand.vmem [shape: f32[2,4,16], index: 0, kind: input, shape index: {}]   ;;  %s494_s1 = inlined_call_operand.vmem [shape: f32[8,4], index: 1, kind: input, shape index: {}]   ;;  %s495_s2 = inlined_call_operand.vmem [shape: f32[2,8,1], index: 2, kind: output, shape index: {0}]   ;;  %s496_s3 = inlined_call_operand.vmem [shape: f32[2,8,1], index: 3, kind: output, shape index: {1}]  }
   0x1   :  { %s448_s14 = smov 0  }
   0x2 LB: > { %s26_s15 = sadd.s32 1, %s413_s13  ;;  %p355_p0 = scmp.ge.s32.totalorder %s417_s14, 1  ;;  %s417_s14 = sphi %s448_s14, %s14_s14   ;;  %s413_s13 = sphi %s446_s13, %s498_s13   ;;  %s409_s12 = sphi %s444_s12, %s497_s12  }
   0x3   : > { %p28_p1 = scmp.ge.s32.totalorder %s26_s15, 2  ;;  %p156_p2 = scmp.lt.s32.totalorder %s417_s14, 3 }
   0x5   : > { %s500_s15 = smov (%p28_p1, %s26_s15), 0  ;;  %p157_p3 = pnand %p355_p0, %p156_p2 }
   0x6   : > { %p185_p4 = scmp.lt.s32.totalorder (!%p157_p3), %s409_s12, 1 }
   0x7   : > { %160 = sbr.rel (%p157_p3) target bundleno = 283 (0x11b), region = 28 }
   0xc   : > { %v208_v0 = vld [vmem:[%s494_s1] sm:$0xff]  ;;  %v419_v1 = vmov 0   ;;  %v420_v2 = vmov 2   ;;  %v421_v3 = vmov 1   ;;  %v422_v4 = vmov 3   ;;  %s502_s12 = smov (!%p185_p4, %s409_s12), 1 }
   0xd   : > { %390 = vset.pattern.permute.xlu0 %v419_v1  ;;  %392 = vset.pattern.permute.xlu1 %v420_v2  ;;  %vm204_vm0 = vcmask 7168   ;;  %v423_v5 = vmov 0.0   ;;  %s356_s18 = sshll.u32 %s502_s12, 2  ;;  %vm238_vm1 = vcmask 130048   ;;  %s357_s22 = sshll.u32 %s502_s12, 3 }
   0xe   : > { %211 = vperm.xlu0 %390, %v208_v0   ;;  %224 = vperm.xlu1 %392, %v208_v0   ;;  %205 = vst.msk [vmem:[#allocation2] sm:$0xff] %vm204_vm0, %v423_v5  ;;  %s191_s21 = scalar_lea.vmem %s493_s0, %s356_s18  ;;  %s195_s25 = scalar_lea.vmem %s495_s2, %s357_s22 }
   0xf   : > { %206 = vst.msk [vmem:[#allocation3] sm:$0xff] %vm204_vm0, %v423_v5  ;;  %v207_v8 = vld [vmem:[%s191_s21] sm:$0xf]  ;;  %s199_s28 = scalar_lea.vmem %s496_s3, %s357_s22 }
  0x10   : > { %v214_v9 = vperm.slane %v207_v8, 0  ;;  %v220_v10 = vperm.slane %v207_v8, 1  ;;  %v227_v11 = vperm.slane %v207_v8, 2  ;;  %v234_v12 = vperm.slane %v207_v8, 3 }
  0x15   : > { %v237_v25 = vld [vmem:[#allocation2] sm:$0xff] }
  0x16   : > { %391 = vset.pattern.permute.xlu0 %v421_v3  ;;  %393 = vset.pattern.permute.xlu1 %v422_v4  ;;  %v245_v28 = vld [vmem:[#allocation3] sm:$0xff] }
  0x17   : > { %217 = vperm.xlu0 %391, %v208_v0   ;;  %231 = vperm.xlu1 %393, %v208_v0  }
  0x1f   : > { %394 = vset.pattern.permute.xlu0 %v422_v4 }
  0x80   : > { %v212_v6 = vpop.permute.xlu0 %211  ;;  %v225_v7 = vpop.permute.xlu1 %224 }
  0x81   : > { %v215_v15 = vmul.f32 %v214_v9, %v212_v6  ;;  %v228_v17 = vmul.f32 %v227_v11, %v225_v7 }
  0x89   : > { %v218_v13 = vpop.permute.xlu0 %217  ;;  %v232_v14 = vpop.permute.xlu1 %231 }
  0x8a   : > { %v221_v16 = vmul.f32 %v220_v10, %v218_v13  ;;  %v235_v19 = vmul.f32 %v234_v12, %v232_v14 }
  0x8c   : > { %v222_v18 = vadd.f32 %v221_v16, %v215_v15 }
  0x8e   : > { %v229_v20 = vadd.f32 %v228_v17, %v222_v18 }
  0x90   : > { %v236_v21 = vadd.f32 %v235_v19, %v229_v20 }
  0x92   : > { %v239_v22 = vsel %vm238_vm1, %v236_v21, 0.0  ;;  %v246_v23 = vmul.f32 %v236_v21, %v236_v21 }
  0x93   : > { %240 = vadd.xlane.f32.xlu2 %v239_v22 }
  0x94   : > { %v247_v24 = vsel %vm238_vm1, %v246_v23, 0.0 }
  0x9b   : > { %248 = vadd.xlane.f32.xlu2 %v247_v24 }
 0x106   : > { %v241_v26 = vpop.xlane.xlu2 %240 }
 0x107   : > { %v242_v27 = vadd.f32 %v241_v26, %v237_v25 }
 0x109   : > { %244 = vst.msk [vmem:[#allocation2] sm:$0xff] %vm204_vm0, %v242_v27 }
 0x10e   : > { %v249_v29 = vpop.xlane.xlu2 %248 }
 0x10f   : > { %v250_v30 = vadd.f32 %v249_v29, %v245_v28 }
 0x110   : > { %v252_v31 = vld [vmem:[#allocation2] sm:$0xff] }
 0x111   : > { %253 = vst.msk [vmem:[%s195_s25] sm:$0xff] %vm204_vm0, %v252_v31 }
 0x112   : > { %251 = vst.msk [vmem:[#allocation3] sm:$0xff] %vm204_vm0, %v250_v30 }
 0x119   : > { %v254_v32 = vld [vmem:[#allocation3] sm:$0xff] }
 0x11a   : > { %255 = vst.msk [vmem:[%s199_s28] sm:$0xff] %vm204_vm0, %v254_v32 }
 0x11b PF: > { %s14_s14 = sadd.s32 1, %s417_s14   ;;  %s497_s12 = smov %s413_s13 }
 0x11c   : > { %p11_p5 = scmp.ge.s32.totalorder %s14_s14, 4   ;;  %s498_s13 = smov %s500_s15 }
 0x11e   :  { %13 = sbr.rel (!%p11_p5) target bundleno = 2 (0x2), region = 74 }

// kernel: bottleneck_forward.3
= control target key start
LH: loop header
LB: loop body
LE: loop exit
PB: predicated region body
PF: predicated region fallthrough
CT: control target
= control target key end

     0   :  { %9 = vsyncpa [#allocation3], 0  ;;  %s644_s0 = inlined_call_operand.vmem [shape: f32[2,4,16], index: 0, kind: input, shape index: {}]   ;;  %s645_s1 = inlined_call_operand.vmem [shape: f32[8,4], index: 1, kind: input, shape index: {}]   ;;  %s646_s2 = inlined_call_operand.vmem [shape: f32[8,1], index: 2, kind: input, shape index: {}]   ;;  %s647_s3 = inlined_call_operand.vmem [shape: f32[8,1], index: 3, kind: input, shape index: {}]   ;;  %s648_s4 = inlined_call_operand.hbm [shape: f32[2,8,16], index: 4, kind: output, shape index: {}]  }
   0x1   :  { %11 = vsyncpa [#allocation3 + $0x1], 0  ;;  %s538_s15 = smov 0   ;;  %s540_s16 = smov 0  }
   0x2   :  { %s542_s17 = smov 0   ;;  %s544_s18 = smov 0  }
   0x3   :  { %s546_s19 = smov 0   ;;  %s548_s20 = smov 0  }
   0x4 LB: > { %s353_s21 = sadd.s32 4294967295, %s507_s20   ;;  %s354_s22 = sadd.s32 4294967294, %s507_s20   ;;  %s507_s20 = sphi %s548_s20, %s17_s20   ;;  %s503_s19 = sphi %s546_s19, %s655_s19   ;;  %s499_s18 = sphi %s544_s18, %s654_s18   ;;  %s495_s17 = sphi %s542_s17, %s653_s17   ;;  %s491_s16 = sphi %s540_s16, %s652_s16   ;;  %s487_s15 = sphi %s538_s15, %s651_s15  }
   0x5   : > { %s29_s23 = sadd.s32 1, %s503_s19  ;;  %s129_s24 = sadd.s32 1, %s495_s17 }
   0x6   : > { %p31_p0 = scmp.ge.s32.totalorder %s29_s23, 2  ;;  %p139_p1 = scmp.ne.s32.totalorder %s495_s17, %s491_s16 }
   0x7   : > { %p140_p2 = scmp.eq.s32.totalorder %s353_s21, 1  ;;  %p145_p3 = scmp.ne.s32.totalorder %s491_s16, %s487_s15 }
   0x8   : > { %s657_s23 = smov (%p31_p0, %s29_s23), 0  ;;  %p146_p5 = scmp.eq.s32.totalorder %s354_s22, 1 }
   0x9   : > { %p578_p4 = por %p140_p2, %p139_p1  ;;  %s124_s26 = ssub.s32 %s503_s19, %s657_s23 }
   0xa   : > { %p357_p6 = scmp.ge.s32.totalorder %s507_s20, 1  ;;  %p127_p7 = scmp.eq.s32.totalorder %s124_s26, 0 }
   0xb   : > { %p585_p8 = por %p146_p5, %p145_p3  ;;  %p183_p9 = scmp.lt.s32.totalorder %s507_s20, 3 }
   0xc   : > { %s591_s28 = scalar_select %p127_p7, %s495_s17, %s129_s24  }
   0xd   : > { %p184_p10 = pnand %p357_p6, %p183_p9 }
   0xe   : > { %p211_p11 = scmp.lt.s32.totalorder (!%p184_p10), %s499_s18, 1  ;;  %s208_s14 = sand.u32 (!%p184_p10), 1, %s491_s16  }
   0xf   : > { %187 = sbr.rel (%p184_p10) target bundleno = 163 (0xa3), region = 36  ;;  %s358_s21 = sshll.u32 (!%p184_p10), %s208_s14, 3 }
  0x10   : > { %s361_s22 = sshll.u32 (!%p184_p10), %s499_s18, 3  ;;  %s210_s30 = scalar_lea.vmem (!%p184_p10), [#allocation2], %s358_s21 }
  0x11   : > { %s277_s29 = scalar_lea.hbm (!%p184_p10), %s648_s4, %s361_s22  ;;  %s279_s5 = sshll.u32 (!%p184_p10), %s210_s30, 4  ;;  %s280_s5 = int_to_ptr.vmem [resolvable:$true] %s279_s5 }
  0x12   : > { %s281_s6 = sshll.u32 (!%p184_p10), %s277_s29, 4  ;;  %s266_s7 = scalar_lea.sflag (!%p184_p10), [#allocation3], %s208_s14  ;;  %s282_s6 = int_to_ptr.hbm [resolvable:$true] %s281_s6 }
  0x13   : > { %s449_s11 = scalar_lea.hbm (!%p184_p10), %s648_s4, 16 }
  0x14   : > { %v219_v0 = vld [vmem:[%s645_s1] sm:$0xff]  ;;  %v509_v1 = vmov 0   ;;  %v510_v2 = vmov 2   ;;  %v511_v5 = vmov 1   ;;  %v512_v6 = vmov 3   ;;  %s212_s9 = scalar_select %p211_p11, %s499_s18, 1 }
  0x15   : > { %423 = vset.pattern.permute.xlu0 %v509_v1  ;;  %425 = vset.pattern.permute.xlu1 %v510_v2  ;;  %v248_v3 = vld [vmem:[%s646_s2] sm:$0xff]  ;;  %vm263_vm0 = vcmask 130048   ;;  %s443_s18 = sshra.s32 %s282_s6, 4  ;;  %s444_s18 = int_to_ptr.hbm [resolvable:$true] %s443_s18 }
  0x16   : > { %222 = vperm.xlu0 %423, %v219_v0   ;;  %235 = vperm.xlu1 %425, %v219_v0   ;;  %v255_v4 = vld [vmem:[%s647_s3] sm:$0xff]  ;;  %s359_s10 = sshll.u32 %s212_s9, 2  ;;  %s445_s8 = scalar_lea.hbm %s444_s18, 8 }
  0x17   : > { %427 = vset.pattern.permute.xlu2 %v509_v1  ;;  %s217_s13 = scalar_lea.vmem %s644_s0, %s359_s10  ;;  %p446_p12 = scmp.ne.s32.totalorder %s444_s18, %s445_s8 }
  0x18   : > { %251 = vperm.xlu2 %427, %v248_v3   ;;  %v218_v9 = vld [vmem:[%s217_s13] sm:$0xf]  ;;  %p450_p1 = scmp.lt.s32.totalorder %s444_s18, %s648_s4  ;;  %p451_p2 = scmp.lt.s32.totalorder %s449_s11, %s445_s8 }
  0x19   : > { %v225_v10 = vperm.slane %v218_v9, 0  ;;  %v231_v11 = vperm.slane %v218_v9, 1  ;;  %v238_v13 = vperm.slane %v218_v9, 2  ;;  %v245_v14 = vperm.slane %v218_v9, 3  ;;  %p447_p13 = pnand %p446_p12, %p578_p4 }
  0x1a   : > { %p452_p3 = por %p451_p2, %p450_p1 }
  0x1b   : > { %p448_p0 = pneg %p447_p13 }
  0x1d   : > { %p453_p5 = pnand %p452_p3, %p448_p0 }
  0x1e   : > { %424 = vset.pattern.permute.xlu0 %v511_v5  ;;  %426 = vset.pattern.permute.xlu1 %v512_v6 }
  0x1f   : > { %228 = vperm.xlu0 %424, %v219_v0   ;;  %242 = vperm.xlu1 %426, %v219_v0  }
  0x20   : > { %258 = vperm.xlu2 %427, %v255_v4  }
  0x27   : > { %428 = vset.pattern.permute.xlu0 %v509_v1 }
  0x72   : > { %v252_v12 = vpop.permute.xlu2 %251 }
  0x7a   : > { %v259_v25 = vpop.permute.xlu2 %258 }
  0x88   : > { %v223_v7 = vpop.permute.xlu0 %222  ;;  %v236_v8 = vpop.permute.xlu1 %235 }
  0x89   : > { %v226_v17 = vmul.f32 %v225_v10, %v223_v7  ;;  %v239_v19 = vmul.f32 %v238_v13, %v236_v8 }
  0x91   : > { %v229_v15 = vpop.permute.xlu0 %228  ;;  %v243_v16 = vpop.permute.xlu1 %242 }
  0x92   : > { %v232_v18 = vmul.f32 %v231_v11, %v229_v15  ;;  %v246_v21 = vmul.f32 %v245_v14, %v243_v16 }
  0x94   : > { %v233_v20 = vadd.f32 %v232_v18, %v226_v17 }
  0x96   : > { %v240_v22 = vadd.f32 %v239_v19, %v233_v20 }
  0x98   : > { %v247_v23 = vadd.f32 %v246_v21, %v240_v22 }
  0x9a   : > { %v254_v24 = vmul.f32 %v252_v12, %v247_v23 }
  0x9c   : > { %v261_v26 = vadd.f32 %v259_v25, %v254_v24 }
  0x9e   : > { %v262_v27 = vmax.f32 %v261_v26, 0.0 }
  0xa0   : > { %264 = vst.msk [vmem:[%s210_s30] sm:$0xff] %vm263_vm0, %v262_v27 }
  0xa1   : > { %456 = shalt.err (!%p453_p5)
}
  0xa2   : > { %364 = dma.vmem_to_hbm [thread:$0]  (%p578_p4), %s280_s5, 128, %s282_s6, %s266_s7  }
  0xa3 PF: > { %p370_p6 = scmp.ge.s32.totalorder %s507_s20, 2  ;;  %s293_s14 = sand.u32 1, %s487_s15  }
  0xa4   : > { %s294_s21 = scalar_lea.sflag [#allocation3], %s293_s14 }
  0xa5   : > { %p367_p7 = pnand %p370_p6, %p585_p8 }
  0xa7   : > { %p368_p9 = pneg %p367_p7 }
  0xa9   : > { %482 = dma.done.wait (%p368_p9), %s294_s21, 128  }
  0xaa   : > { %484 = vsyncadd (%p368_p9), %s294_s21, 4294967168  ;;  %s17_s20 = sadd.s32 1, %s507_s20   ;;  %s651_s15 = smov %s491_s16 }
  0xab   : > { %p14_p10 = scmp.ge.s32.totalorder %s17_s20, 4   ;;  %s652_s16 = smov %s495_s17 }
  0xac   : > { %s653_s17 = smov %s591_s28  ;;  %s654_s18 = smov %s503_s19 }
  0xad   : > { %s655_s19 = smov %s657_s23  ;;  %16 = sbr.rel (!%p14_p10) target bundleno = 4 (0x4), region = 71 }
  0xb2   :  { %300 = vsyncpa [#allocation3], 1 }
  0xb3   :  { %302 = vsyncpa [#allocation3 + $0x1], 1 }

</bundles_post_ra>
